<compile_context>
chip_gen: v6e
topology: v6e:2x2x1
jax: 0.10.0
libtpu: 0.0.40
codegen_flags: <defaults>
</compile_context>

<pallas_src>
import functools
import numpy as np
import jax
import jax.numpy as jnp
from jax.experimental import pallas as pl
from jax.experimental.pallas import tpu as pltpu

TEMP = 0.05
BN_EPS = 1e-5
VMEM_LIMIT = 48 * 1024 * 1024          # <= v7x physical VMEM (64 MiB / TC)


def _round_up(x, m):
    return (x + m - 1) // m * m


# ---------------------------------------------------------------------------
# Pallas kernels
# ---------------------------------------------------------------------------
def _matmul_bn_act_kernel(a_ref, b_ref, scale_ref, shift_ref, o_ref, *, relu):
    # conv-as-matmul (bf16 MXU, f32 acc) + folded BatchNorm + optional ReLU
    acc = jnp.dot(a_ref[...], b_ref[...], preferred_element_type=jnp.float32)
    acc = acc * scale_ref[...] + shift_ref[...]
    if relu:
        acc = jnp.maximum(acc, 0.0)
    o_ref[...] = acc.astype(o_ref.dtype)


def _matmul_bn_res_act_kernel(a_ref, b_ref, scale_ref, shift_ref, res_ref, o_ref, *, relu):
    # same, plus fused residual add (separate kernel: no dummy zero residual DMA)
    acc = jnp.dot(a_ref[...], b_ref[...], preferred_element_type=jnp.float32)
    acc = acc * scale_ref[...] + shift_ref[...] + res_ref[...].astype(jnp.float32)
    if relu:
        acc = jnp.maximum(acc, 0.0)
    o_ref[...] = acc.astype(o_ref.dtype)


def _maxpool_kernel(p_ref, o_ref):
    # p_ref: [9, tm, C] window taps -> elementwise max over taps
    o_ref[...] = jnp.max(p_ref[...], axis=0)


def _gvb_head_kernel(feat_ref, w_ref, y_ref, br_ref, *, temp, gvbg, normalize, cpad):
    # feat_ref: [B, S, F] (S = spatial positions of layer4 output)
    x = jnp.mean(feat_ref[...].astype(jnp.float32), axis=1)     # AdaptiveAvgPool2d + view
    if normalize:
        ssq = jnp.sum(x * x, axis=-1, keepdims=True)
        x = x * jax.lax.rsqrt(jnp.maximum(ssq, 1e-24))           # F.normalize(dim=1), EUP rsqrt
    # one fused matmul: w_ref = [F, 2*cpad] = [fc | gvbg], lane-dense output
    out = jnp.dot(x, w_ref[...], preferred_element_type=jnp.float32) * (1.0 / temp)
    fc = out[:, :cpad]
    bridge = out[:, cpad:]
    y_ref[...] = (fc - bridge) if gvbg else fc
    br_ref[...] = bridge


# ---------------------------------------------------------------------------
# Wrappers around pallas_call
# ---------------------------------------------------------------------------
def matmul_bn_act(a, b, scale, shift, residual=None, relu=True, out_dtype=jnp.bfloat16):
    """a: [M, K] bf16 im2col patches; b: [K, N] bf16 weights.

    Tiled over M (tm<=256) with the weight block resident in VMEM across the
    grid.  K is kept as a single block (max K here is 4608 -> ~4.5 MiB bf16),
    so no K-axis accumulator is required and everything double-buffers well
    under the 48 MiB VMEM budget.
    """
    M, K = a.shape
    _, N = b.shape
    K_pad = _round_up(K, 128)
    tm = min(256, _round_up(M, 128))
    M_pad = _round_up(M, tm)

    if K_pad != K:
        a = jnp.pad(a, ((0, 0), (0, K_pad - K)))
        b = jnp.pad(b, ((0, K_pad - K), (0, 0)))
    if M_pad != M:
        a = jnp.pad(a, ((0, M_pad - M), (0, 0)))
    scale2 = scale.reshape(1, N).astype(jnp.float32)
    shift2 = shift.reshape(1, N).astype(jnp.float32)

    in_specs = [
        pl.BlockSpec((tm, K_pad), lambda i: (i, 0)),
        pl.BlockSpec((K_pad, N), lambda i: (0, 0)),
        pl.BlockSpec((1, N), lambda i: (0, 0)),
        pl.BlockSpec((1, N), lambda i: (0, 0)),
    ]
    args = [a, b, scale2, shift2]
    if residual is None:
        kernel = functools.partial(_matmul_bn_act_kernel, relu=relu)
    else:
        if M_pad != M:
            residual = jnp.pad(residual, ((0, M_pad - M), (0, 0)))
        in_specs.append(pl.BlockSpec((tm, N), lambda i: (i, 0)))
        args.append(residual)
        kernel = functools.partial(_matmul_bn_res_act_kernel, relu=relu)

    out = pl.pallas_call(
        kernel,
        out_shape=jax.ShapeDtypeStruct((M_pad, N), out_dtype),
        grid=(M_pad // tm,),
        in_specs=in_specs,
        out_specs=pl.BlockSpec((tm, N), lambda i: (i, 0)),
        compiler_params=pltpu.CompilerParams(
            dimension_semantics=("parallel",),
            vmem_limit_bytes=VMEM_LIMIT,
        ),
    )(*args)
    return out[:M]


def conv_bn_act(x, w, scale, shift, stride, padding, residual=None, relu=True):
    """x: [B,H,W,Cin] NHWC bf16; w: [KH,KW,Cin,Cout] f32."""
    B, H, W, Cin = x.shape
    KH, KW, _, Cout = w.shape
    xp = jnp.pad(x, ((0, 0), (padding, padding), (padding, padding), (0, 0)))
    Ho = (H + 2 * padding - KH) // stride + 1
    Wo = (W + 2 * padding - KW) // stride + 1
    # TODO(synk): im2col patches are still materialized in HBM (KH*KW-fold
    # activation blow-up); a shifted-window BlockSpec/DMA gather would avoid it.
    if KH == 1 and KW == 1:
        a = xp[:, ::stride, ::stride, :].reshape(B * Ho * Wo, Cin)
    else:
        pats = []
        for i in range(KH):
            for j in range(KW):
                pats.append(xp[:, i:i + stride * (Ho - 1) + 1:stride,
                               j:j + stride * (Wo - 1) + 1:stride, :])
        a = jnp.concatenate(pats, axis=-1).reshape(B * Ho * Wo, KH * KW * Cin)
    b = w.reshape(KH * KW * Cin, Cout).astype(jnp.bfloat16)
    res = None if residual is None else residual.reshape(B * Ho * Wo, Cout)
    out = matmul_bn_act(a.astype(jnp.bfloat16), b, scale, shift, residual=res, relu=relu)
    return out.reshape(B, Ho, Wo, Cout)


def maxpool_3x3_s2_p1(x):
    B, H, W, C = x.shape
    Ho = (H + 2 - 3) // 2 + 1
    Wo = (W + 2 - 3) // 2 + 1
    xp = jnp.pad(x, ((0, 0), (1, 1), (1, 1), (0, 0)), constant_values=-jnp.inf)
    pats = [xp[:, i:i + 2 * (Ho - 1) + 1:2, j:j + 2 * (Wo - 1) + 1:2, :]
            .reshape(B * Ho * Wo, C)
            for i in range(3) for j in range(3)]
    p = jnp.stack(pats, axis=0)                         # [9, M, C]
    M = B * Ho * Wo
    tm = min(512, _round_up(M, 128))
    M_pad = _round_up(M, tm)
    if M_pad != M:
        p = jnp.pad(p, ((0, 0), (0, M_pad - M), (0, 0)))
    out = pl.pallas_call(
        _maxpool_kernel,
        out_shape=jax.ShapeDtypeStruct((M_pad, C), x.dtype),
        grid=(M_pad // tm,),
        in_specs=[pl.BlockSpec((9, tm, C), lambda i: (0, i, 0))],
        out_specs=pl.BlockSpec((tm, C), lambda i: (i, 0)),
        compiler_params=pltpu.CompilerParams(
            dimension_semantics=("parallel",),
            vmem_limit_bytes=VMEM_LIMIT,
        ),
    )(p)
    return out[:M].reshape(B, Ho, Wo, C)


def gvb_head(feat, wfc_t, wg_t, temp=TEMP, gvbg=True, normalize=True):
    B, S, F = feat.shape
    _, C = wfc_t.shape
    Cpad = _round_up(C, 128)
    wcat = jnp.concatenate(
        [jnp.pad(wfc_t, ((0, 0), (0, Cpad - C))),
         jnp.pad(wg_t, ((0, 0), (0, Cpad - C)))], axis=1).astype(jnp.float32)  # [F, 2*Cpad]
    y, bridge = pl.pallas_call(
        functools.partial(_gvb_head_kernel, temp=temp, gvbg=gvbg,
                          normalize=normalize, cpad=Cpad),
        out_shape=(jax.ShapeDtypeStruct((B, Cpad), jnp.float32),
                   jax.ShapeDtypeStruct((B, Cpad), jnp.float32)),
        grid=(1,),
        in_specs=[pl.BlockSpec((B, S, F), lambda i: (0, 0, 0)),
                  pl.BlockSpec((F, 2 * Cpad), lambda i: (0, 0))],
        out_specs=(pl.BlockSpec((B, Cpad), lambda i: (0, 0)),
                   pl.BlockSpec((B, Cpad), lambda i: (0, 0))),
        compiler_params=pltpu.CompilerParams(vmem_limit_bytes=VMEM_LIMIT),
    )(feat, wcat)
    return y[:, :C], bridge[:, :C]


# ---------------------------------------------------------------------------
# ResNet18-style backbone (BasicBlock), parameters & forward
# ---------------------------------------------------------------------------
def _conv_w(key, kh, kw, cin, cout):
    std = float(np.sqrt(2.0 / (kh * kw * cin)))
    return jax.random.normal(key, (kh, kw, cin, cout), jnp.float32) * std


def _bn(key, c):
    # inference-mode BN folded to per-channel scale/shift (running_mean=0, running_var=1)
    gamma = 1.0 + 0.02 * jax.random.normal(key, (c,), jnp.float32)
    scale = gamma / jnp.sqrt(jnp.float32(1.0 + BN_EPS))
    shift = jnp.zeros((c,), jnp.float32)
    return scale, shift


def make_params(key, class_num):
    keys = jax.random.split(key, 64)
    ki = iter(keys)
    params = {'conv1': _conv_w(next(ki), 7, 7, 3, 64), 'bn1': _bn(next(ki), 64)}
    stages = [(64, 64, 1), (64, 128, 2), (128, 256, 2), (256, 512, 2)]
    layers = []
    for cin, cout, stride in stages:
        blocks = []
        for b in range(2):
            s = stride if b == 0 else 1
            c_in = cin if b == 0 else cout
            blk = {'stride': s,
                   'w1': _conv_w(next(ki), 3, 3, c_in, cout), 'bn1': _bn(next(ki), cout),
                   'w2': _conv_w(next(ki), 3, 3, cout, cout), 'bn2': _bn(next(ki), cout)}
            if s != 1 or c_in != cout:
                blk['wd'] = _conv_w(next(ki), 1, 1, c_in, cout)
                blk['bnd'] = _bn(next(ki), cout)
            blocks.append(blk)
        layers.append(blocks)
    params['layers'] = layers
    feat_dim = 512
    std = float(np.sqrt(2.0 / feat_dim))                       # kaiming_normal_, fan_in
    wfc = jax.random.normal(next(ki), (class_num, feat_dim), jnp.float32) * std
    wg = jax.random.normal(next(ki), (class_num, feat_dim), jnp.float32) * std
    params['wfc_t'] = wfc.T                                    # pass transposed [F, C]
    params['wg_t'] = wg.T
    return params


def basic_block(x, blk):
    s = blk['stride']
    identity = x
    out = conv_bn_act(x, blk['w1'], *blk['bn1'], stride=s, padding=1, relu=True)
    if 'wd' in blk:
        identity = conv_bn_act(x, blk['wd'], *blk['bnd'], stride=s, padding=0, relu=False)
    # out = relu(bn2(conv2(out)) + identity) -- residual & relu fused in kernel epilogue
    out = conv_bn_act(out, blk['w2'], *blk['bn2'], stride=1, padding=1,
                      residual=identity, relu=True)
    return out


def gvb_resnet_cosine_forward(params, x_nchw, gvbg=True, normalize=True, temp=TEMP):
    x = jnp.transpose(x_nchw, (0, 2, 3, 1)).astype(jnp.bfloat16)       # NCHW -> NHWC, bf16 acts
    x = conv_bn_act(x, params['conv1'], *params['bn1'], stride=2, padding=3, relu=True)
    x = maxpool_3x3_s2_p1(x)
    for blocks in params['layers']:
        for blk in blocks:
            x = basic_block(x, blk)
    B, H, W, F = x.shape
    feat = x.reshape(B, H * W, F)                                      # spatial kept for in-kernel avgpool
    y, bridge = gvb_head(feat, params['wfc_t'], params['wg_t'],
                         temp=temp, gvbg=gvbg, normalize=normalize)
    return y, bridge


if __name__ == "__main__":
    key = jax.random.PRNGKey(0)
    pkey, xkey = jax.random.split(key)
    class_num = 32
    params = make_params(pkey, class_num)
    x = jax.random.normal(xkey, (2, 3, 32, 32), jnp.float32)           # NCHW like PyTorch
    y, bridge = gvb_resnet_cosine_forward(params, x, gvbg=True, normalize=True)
    jax.block_until_ready((y, bridge))
    assert y.shape == (2, class_num) and bridge.shape == (2, class_num)
    assert bool(jnp.all(jnp.isfinite(y))) and bool(jnp.all(jnp.isfinite(bridge)))
    print("KERNEL_OK")
</pallas_src>

<mosaic_0001>
module attributes {stable_mosaic.version = 11 : i64} {
  func.func @_matmul_bn_act_kernel(%arg0: i32, %arg1: memref<256x256xbf16, #tpu.memory_space<vmem>>, %arg2: memref<256x64xbf16, #tpu.memory_space<vmem>>, %arg3: memref<1x64xf32, #tpu.memory_space<vmem>>, %arg4: memref<1x64xf32, #tpu.memory_space<vmem>>, %arg5: memref<256x64xbf16, #tpu.memory_space<vmem>>) attributes {dimension_semantics = [#tpu.dimension_semantics<parallel>], iteration_bounds = array<i64: 2>, scalar_prefetch = 0 : i64, scratch_operands = 0 : i64, tpu.core_type = #tpu.core_type<tc>, window_params = [{transform_indices = @transform_0, window_bounds = array<i64: 256, 256>}, {pipeline_mode = #tpu.pipeline_mode<synchronous>, transform_indices = @transform_1, window_bounds = array<i64: 256, 64>}, {pipeline_mode = #tpu.pipeline_mode<synchronous>, transform_indices = @transform_2, window_bounds = array<i64: 1, 64>}, {pipeline_mode = #tpu.pipeline_mode<synchronous>, transform_indices = @transform_3, window_bounds = array<i64: 1, 64>}, {transform_indices = @transform_4, window_bounds = array<i64: 256, 64>}]} {
    %c0 = arith.constant 0 : index
    %c0_0 = arith.constant 0 : index
    %0 = vector.load %arg1[%c0, %c0_0] : memref<256x256xbf16, #tpu.memory_space<vmem>>, vector<256x256xbf16>
    %c0_1 = arith.constant 0 : index
    %c0_2 = arith.constant 0 : index
    %1 = vector.load %arg2[%c0_1, %c0_2] : memref<256x64xbf16, #tpu.memory_space<vmem>>, vector<256x64xbf16>
    %cst = arith.constant dense<0.000000e+00> : vector<256x64xf32>
    %2 = tpu.matmul %0, %1, %cst {dimension_numbers = #tpu.dot_dimension_numbers<[1], [0], [0], [1], [0, 0, 1, 1], [], []>} : vector<256x256xbf16>, vector<256x64xbf16>, vector<256x64xf32> -> vector<256x64xf32>
    %c0_3 = arith.constant 0 : index
    %c0_4 = arith.constant 0 : index
    %3 = vector.load %arg3[%c0_3, %c0_4] : memref<1x64xf32, #tpu.memory_space<vmem>>, vector<1x64xf32>
    %4 = vector.broadcast %3 : vector<1x64xf32> to vector<256x64xf32>
    %5 = arith.mulf %2, %4 : vector<256x64xf32>
    %c0_5 = arith.constant 0 : index
    %c0_6 = arith.constant 0 : index
    %6 = vector.load %arg4[%c0_5, %c0_6] : memref<1x64xf32, #tpu.memory_space<vmem>>, vector<1x64xf32>
    %7 = vector.broadcast %6 : vector<1x64xf32> to vector<256x64xf32>
    %8 = arith.addf %5, %7 : vector<256x64xf32>
    %cst_7 = arith.constant 0.000000e+00 : f32
    %9 = vector.broadcast %cst_7 : f32 to vector<256x64xf32>
    %10 = arith.maximumf %8, %9 : vector<256x64xf32>
    %11 = arith.truncf %10 : vector<256x64xf32> to vector<256x64xbf16>
    %c0_8 = arith.constant 0 : index
    %c0_9 = arith.constant 0 : index
    %12 = vector.load %arg5[%c0_8, %c0_9] : memref<256x64xbf16, #tpu.memory_space<vmem>>, vector<256x64xbf16>
    tpu.vector_store %arg5[%c0_8, %c0_9], %11 {strides = array<i32>} : memref<256x64xbf16, #tpu.memory_space<vmem>>, vector<256x64xbf16>,
    return
  }
  func.func @transform_0(%arg0: i32) -> (i32, i32) {
    %c0_i32 = arith.constant 0 : i32
    %c0_i32_0 = arith.constant 0 : i32
    return %arg0, %c0_i32 : i32, i32
  }
  func.func @transform_1(%arg0: i32) -> (i32, i32) {
    %c0_i32 = arith.constant 0 : i32
    %c0_i32_0 = arith.constant 0 : i32
    %c0_i32_1 = arith.constant 0 : i32
    return %c0_i32, %c0_i32_0 : i32, i32
  }
  func.func @transform_2(%arg0: i32) -> (i32, i32) {
    %c0_i32 = arith.constant 0 : i32
    %c0_i32_0 = arith.constant 0 : i32
    %c0_i32_1 = arith.constant 0 : i32
    return %c0_i32, %c0_i32_0 : i32, i32
  }
  func.func @transform_3(%arg0: i32) -> (i32, i32) {
    %c0_i32 = arith.constant 0 : i32
    %c0_i32_0 = arith.constant 0 : i32
    %c0_i32_1 = arith.constant 0 : i32
    return %c0_i32, %c0_i32_0 : i32, i32
  }
  func.func @transform_4(%arg0: i32) -> (i32, i32) {
    %c0_i32 = arith.constant 0 : i32
    %c0_i32_0 = arith.constant 0 : i32
    return %arg0, %c0_i32 : i32, i32
  }
}

</mosaic_0001>

<bundles_post_ra>
// kernel: tpu_custom_call.1
= control target key start
LH: loop header
LB: loop body
LE: loop exit
PB: predicated region body
PF: predicated region fallthrough
CT: control target
= control target key end

     0   :  { %9 = vsyncpa [#allocation3], 0  ;;  %s1818_s0 = inlined_call_operand.hbm [shape: bf16[512,256], index: 0, kind: input, shape index: {}]   ;;  %s1819_s1 = inlined_call_operand.vmem [shape: bf16[256,64], index: 1, kind: input, shape index: {}]   ;;  %s1820_s2 = inlined_call_operand.vmem [shape: f32[1,64], index: 2, kind: input, shape index: {}]   ;;  %s1821_s3 = inlined_call_operand.vmem [shape: f32[1,64], index: 3, kind: input, shape index: {}]   ;;  %s1822_s4 = inlined_call_operand.vmem [shape: bf16[512,64], index: 4, kind: output, shape index: {}]  }
   0x1   :  { %11 = vsyncpa [#allocation3 + $0x1], 0  ;;  %s1496_s15 = smov 0   ;;  %s1498_s16 = smov 0  }
   0x2   :  { %s1500_s17 = smov 0   ;;  %s1502_s18 = smov 0  }
   0x3 LB: > { %s1041_s19 = sadd.s32 4294967295, %s1466_s18   ;;  %s1516_s20 = sadd.s32 1, %s1466_s18   ;;  %s1466_s18 = sphi %s1502_s18, %s1831_s18   ;;  %s1462_s17 = sphi %s1500_s17, %s1830_s17   ;;  %s1458_s16 = sphi %s1498_s16, %s1829_s16   ;;  %s1454_s15 = sphi %s1496_s15, %s1828_s15  }
   0x4   : > { %s21_s21 = ssub.s32 %s1466_s18, %s1516_s20  ;;  %s24_s22 = sadd.s32 1, %s1462_s17 }
   0x5   : > { %p22_p0 = scmp.eq.s32.totalorder %s21_s21, 0  ;;  %p31_p1 = scmp.ne.s32.totalorder %s1462_s17, %s1458_s16 }
   0x6   : > { %p32_p2 = scmp.eq.s32.totalorder %s1466_s18, 0  ;;  %p37_p3 = scmp.ne.s32.totalorder %s1458_s16, %s1454_s15 }
   0x7   : > { %s1526_s23 = scalar_select %p22_p0, %s1462_s17, %s24_s22  }
   0x8   : > { %p33_p4 = por %p32_p2, %p31_p1  ;;  %p38_p5 = scmp.eq.s32.totalorder %s1041_s19, 0 }
   0x9   : > { %p1305_p6 = scmp.lt.s32.totalorder %s1466_s18, 2  ;;  %s159_s25 = sand.u32 1, %s1462_s17  }
   0xa   : > { %p1531_p7 = por %p38_p5, %p37_p3  ;;  %s1045_s26 = sshll.u32 %s159_s25, 8 }
   0xb   : > { %s1138_s27 = sshll.u32 %s1466_s18, 12  ;;  %s163_s5 = scalar_lea.vmem [#allocation2], %s1045_s26 }
   0xc   : > { %s1824_s24 = scalar_select %p1531_p7, 1, 0 }
   0xd   : > { %s1540_s30 = scalar_lea.hbm %s1818_s0, %s1138_s27  ;;  %s171_s6 = sshll.u32 %s163_s5, 4  ;;  %s1542_s6 = int_to_ptr.vmem [resolvable:$true] %s171_s6 }
   0xe   : > { %p1544_p8 = pnand %p1305_p6, %p33_p4  ;;  %s1549_s8 = scalar_lea.sflag [#allocation3], %s159_s25 }
   0xf   : > { %s1404_s9 = scalar_lea.hbm %s1540_s30, 4096  ;;  %s1409_s12 = scalar_lea.hbm %s1818_s0, 8192 }
  0x10   : > { %p1405_p10 = scmp.ne.s32.totalorder %s1540_s30, %s1404_s9  ;;  %p1406_p11 = pneg %p1544_p8 }
  0x11   : > { %p1410_p0 = scmp.lt.s32.totalorder %s1540_s30, %s1818_s0  ;;  %p1411_p1 = scmp.lt.s32.totalorder %s1409_s12, %s1404_s9 }
  0x12   : > { %p1407_p12 = pnand %p1406_p11, %p1405_p10 }
  0x13   : > { %p1412_p2 = por %p1411_p1, %p1410_p0 }
  0x14   : > { %p1408_p13 = pneg %p1407_p12 }
  0x16   : > { %p1413_p3 = pnand %p1412_p2, %p1408_p13 }
  0x18   : > { %1416 = shalt.err (!%p1413_p3)
}
  0x19   : > { %s1417_s15 = scalar_lea.vmem %s1542_s6, 4096  ;;  %s1468_s21 = smov [#allocation2]  }
  0x1a   : > { %p1418_p4 = scmp.ne.s32.totalorder %s1542_s6, %s1417_s15  ;;  %s1422_s22 = sshll.u32 %s1468_s21, 4  ;;  %s1423_s22 = int_to_ptr.vmem [resolvable:$false] %s1422_s22 }
  0x1b   : > { %s1424_s25 = scalar_lea.vmem %s1423_s22, 8192  ;;  %p1425_p10 = scmp.lt.s32.totalorder %s1542_s6, %s1423_s22 }
  0x1c   : > { %p1420_p5 = pnand %p1418_p4, %p1406_p11  ;;  %p1426_p12 = scmp.lt.s32.totalorder %s1424_s25, %s1417_s15 }
  0x1e   : > { %p1421_p6 = pneg %p1420_p5  ;;  %p1427_p9 = por %p1426_p12, %p1425_p10 }
  0x20   : > { %p1428_p7 = pnand %p1427_p9, %p1421_p6 }
  0x22   : > { %1431 = shalt.err (!%p1428_p7)
}
  0x23   : > { %s1469_s26 = smov 128   ;;  %s1470_s27 = smov 8  }
  0x24   : > { %1304 = dma.hbm_to_vmem [thread:$0]  (!%p1544_p8), %s1540_s30, 4096, %s1542_s6, %s1549_s8, %s1469_s26, %s1469_s26, %s1470_s27  }
  0x25   : > { %p179_p11 = scmp.lt.s32.totalorder %s1466_s18, 3  ;;  %p1826_p13 = scmp.ge.s32.totalorder %s1466_s18, 1 }
  0x27   : > { %p180_p0 = pnand %p1826_p13, %p179_p11 }
  0x28   : > { %s185_s28 = sand.u32 (!%p180_p0), 1, %s1458_s16   ;;  %p1827_p7 = scmp.ne.s32.totalorder (!%p180_p0), %s1824_s24, 0 }
  0x29   : > { %183 = sbr.rel (%p180_p0) target bundleno = 346 (0x15a), region = 36  ;;  %s1050_s29 = sshll.u32 (!%p180_p0), %s185_s28, 8 }
  0x2a   : > { %s186_s5 = scalar_lea.sflag (!%p180_p0), [#allocation3], %s185_s28  ;;  %s1574_s9 = scalar_lea.vmem (!%p180_p0), [#allocation2], %s1050_s29 }
  0x2e   : > { %1449 = dma.done.wait (%p1827_p7), %s186_s5, 4096  }
  0x2f   : > { %1451 = vsyncadd (%p1827_p7), %s186_s5, 4294963200  ;;  %v1340_v0 = vld [vmem:[%s1819_s1 + $0x78] sm:$0xff]   ;;  %v1342_v2 = vld [vmem:[%s1819_s1 + $0x70] sm:$0xff]   ;;  %s1051_s25 = sshll.u32 %s1041_s19, 5  ;;  %vm941_vm0 = vcmask 519168  }
  0x30   : > { %v1341_v1 = vld [vmem:[%s1819_s1 + $0x38] sm:$0xff]   ;;  %1171 = vmatprep.subr.bf16.mxu0 %v1340_v0  ;;  %1283 = vmatprep.subr.bf16.mxu1 %v1340_v0  ;;  %v1343_v3 = vld [vmem:[%s1819_s1 + $0x30] sm:$0xff]   ;;  %v1344_v4 = vld [vmem:[%s1819_s1 + $0x68] sm:$0xff]   ;;  %p216_p8 = scmp.lt.s32.totalorder %s1051_s25, 63 }
  0x31   : > { %1172 = vmatpush3.bf16.msra.mxu0 %v1341_v1  ;;  %1291 = vmatpush3.bf16.msra.mxu1 %v1341_v1  ;;  %v1345_v5 = vld [vmem:[%s1819_s1 + $0x28] sm:$0xff]   ;;  %v1346_v6 = vld [vmem:[%s1819_s1 + $0x60] sm:$0xff]   ;;  %v1348_v8 = vld [vmem:[%s1819_s1 + $0x58] sm:$0xff]  }
  0x32   : > { %1173 = vmatprep.subr.bf16.mxu0 %v1342_v2  ;;  %1284 = vmatprep.subr.bf16.mxu1 %v1342_v2  ;;  %v1347_v7 = vld [vmem:[%s1819_s1 + $0x20] sm:$0xff]   ;;  %v1349_v9 = vld [vmem:[%s1819_s1 + $0x18] sm:$0xff]   ;;  %v1350_v10 = vld [vmem:[%s1819_s1 + $0x50] sm:$0xff]   ;;  %s1833_s25 = smov (!%p216_p8, %s1051_s25), 63 }
  0x33   : > { %v1358_v11 = vld [vmem:[%s1574_s9 + $0x4] ss:$8 sps:$4 sm:$0xff]   ;;  %v1351_v13 = vld [vmem:[%s1819_s1 + $0x10] sm:$0xff]   ;;  %v1356_v18 = vld [vmem:[%s1574_s9] ss:$8 sps:$4 sm:$0xff]   ;;  %s1052_s18 = sshll.u32 %s1833_s25, 2 }
  0x34   : > { %v1361_v12 = vld [vmem:[%s1574_s9 + $0x84] ss:$8 sps:$4 sm:$0xff]   ;;  %574 = vmatprep.mubr.bf16.mxu0 %v1358_v11  ;;  %v1359_v19 = vld [vmem:[%s1574_s9 + $0x80] ss:$8 sps:$4 sm:$0xff]   ;;  %v1362_v20 = vld [vmem:[%s1574_s9 + $0x14] ss:$8 sps:$4 sm:$0xff]   ;;  %s1681_s5 = scalar_lea.vmem %s1822_s4, %s1052_s18 }
  0x35   : > { %1174 = vmatpush3.bf16.msra.mxu0 %v1343_v3  ;;  %1292 = vmatpush3.bf16.msra.mxu1 %v1343_v3  ;;  %v1352_v14 = vld [vmem:[%s1819_s1 + $0x48] sm:$0xff]   ;;  %v1354_v16 = vld [vmem:[%s1819_s1 + $0x40] sm:$0xff]   ;;  %v1364_v21 = vld [vmem:[%s1574_s9 + $0x94] ss:$8 sps:$4 sm:$0xff]  }
  0x36   : > { %1175 = vmatprep.subr.bf16.mxu0 %v1344_v4  ;;  %1285 = vmatprep.subr.bf16.mxu1 %v1344_v4  ;;  %v1353_v15 = vld [vmem:[%s1819_s1 + $0x8] sm:$0xff]   ;;  %v1355_v17 = vld [vmem:[%s1819_s1] sm:$0xff]   ;;  %v1366_v22 = vld [vmem:[%s1574_s9 + $0x10] ss:$8 sps:$4 sm:$0xff]  }
  0x37   : > { %638 = vmatprep.mubr.bf16.mxu1 %v1361_v12  ;;  %v1367_v23 = vld [vmem:[%s1574_s9 + $0x90] ss:$8 sps:$4 sm:$0xff]   ;;  %v1368_v24 = vld [vmem:[%s1574_s9 + $0x24] ss:$8 sps:$4 sm:$0xff]   ;;  %v1372_v26 = vld [vmem:[%s1574_s9 + $0x20] ss:$8 sps:$4 sm:$0xff]  }
  0x38   : > { %v1370_v25 = vld [vmem:[%s1574_s9 + $0xa4] ss:$8 sps:$4 sm:$0xff]   ;;  %v1373_v27 = vld [vmem:[%s1574_s9 + $0xa0] ss:$8 sps:$4 sm:$0xff]   ;;  %v1374_v28 = vld [vmem:[%s1574_s9 + $0x34] ss:$8 sps:$4 sm:$0xff]  }
  0x39   : > { %1176 = vmatpush3.bf16.msra.mxu0 %v1345_v5  ;;  %1293 = vmatpush3.bf16.msra.mxu1 %v1345_v5  ;;  %v1376_v29 = vld [vmem:[%s1574_s9 + $0xb4] ss:$8 sps:$4 sm:$0xff]   ;;  %v1378_v30 = vld [vmem:[%s1574_s9 + $0x30] ss:$8 sps:$4 sm:$0xff]   ;;  %v1380_v32 = vld [vmem:[%s1574_s9 + $0x44] ss:$8 sps:$4 sm:$0xff]  }
  0x3a   : > { %1177 = vmatprep.subr.bf16.mxu0 %v1346_v6  ;;  %1286 = vmatprep.subr.bf16.mxu1 %v1346_v6  ;;  %v1379_v31 = vld [vmem:[%s1574_s9 + $0xb0] ss:$8 sps:$4 sm:$0xff]   ;;  %v1382_v33 = vld [vmem:[%s1574_s9 + $0xc4] ss:$8 sps:$4 sm:$0xff]   ;;  %v1384_v34 = vld [vmem:[%s1574_s9 + $0x40] ss:$8 sps:$4 sm:$0xff]  }
  0x3b   : > { %v1385_v35 = vld [vmem:[%s1574_s9 + $0xc0] ss:$8 sps:$4 sm:$0xff]   ;;  %v1386_v36 = vld [vmem:[%s1574_s9 + $0x54] ss:$8 sps:$4 sm:$0xff]   ;;  %v1390_v38 = vld [vmem:[%s1574_s9 + $0x50] ss:$8 sps:$4 sm:$0xff]  }
  0x3c   : > { %v1388_v37 = vld [vmem:[%s1574_s9 + $0xd4] ss:$8 sps:$4 sm:$0xff]   ;;  %v1391_v39 = vld [vmem:[%s1574_s9 + $0xd0] ss:$8 sps:$4 sm:$0xff]   ;;  %v1392_v40 = vld [vmem:[%s1574_s9 + $0x64] ss:$8 sps:$4 sm:$0xff]  }
  0x3d   : > { %1178 = vmatpush3.bf16.msra.mxu0 %v1347_v7  ;;  %1294 = vmatpush3.bf16.msra.mxu1 %v1347_v7  ;;  %v1394_v41 = vld [vmem:[%s1574_s9 + $0xe4] ss:$8 sps:$4 sm:$0xff]   ;;  %v1396_v42 = vld [vmem:[%s1574_s9 + $0x60] ss:$8 sps:$4 sm:$0xff]   ;;  %v1398_v44 = vld [vmem:[%s1574_s9 + $0x74] ss:$8 sps:$4 sm:$0xff]  }
  0x3e   : > { %1179 = vmatprep.subr.bf16.mxu0 %v1348_v8  ;;  %1287 = vmatprep.subr.bf16.mxu1 %v1348_v8  ;;  %v1397_v43 = vld [vmem:[%s1574_s9 + $0xe0] ss:$8 sps:$4 sm:$0xff]   ;;  %v1400_v45 = vld [vmem:[%s1574_s9 + $0xf4] ss:$8 sps:$4 sm:$0xff]   ;;  %v1402_v46 = vld [vmem:[%s1574_s9 + $0x70] ss:$8 sps:$4 sm:$0xff]  }
  0x3f   : > { %v1403_v47 = vld [vmem:[%s1574_s9 + $0xf0] ss:$8 sps:$4 sm:$0xff]   ;;  %v1665_v51 = vld [vmem:[%s1820_s2] ss:$0 sm:$0xff] }
  0x40   : > { %v1670_v55 = vld [vmem:[%s1821_s3] ss:$0 sm:$0xff] }
  0x41   : > { %1180 = vmatpush3.bf16.msra.mxu0 %v1349_v9  ;;  %1295 = vmatpush3.bf16.msra.mxu1 %v1349_v9 }
  0x42   : > { %1181 = vmatprep.subr.bf16.mxu0 %v1350_v10  ;;  %1288 = vmatprep.subr.bf16.mxu1 %v1350_v10 }
  0x45   : > { %1182 = vmatpush3.bf16.msra.mxu0 %v1351_v13  ;;  %1296 = vmatpush3.bf16.msra.mxu1 %v1351_v13 }
  0x46   : > { %1183 = vmatprep.subr.bf16.mxu0 %v1352_v14  ;;  %1289 = vmatprep.subr.bf16.mxu1 %v1352_v14 }
  0x49   : > { %1184 = vmatpush3.bf16.msra.mxu0 %v1353_v15  ;;  %1297 = vmatpush3.bf16.msra.mxu1 %v1353_v15 }
  0x4a   : > { %1185 = vmatprep.subr.bf16.mxu0 %v1354_v16  ;;  %1290 = vmatprep.subr.bf16.mxu1 %v1354_v16 }
  0x4d   : > { %1186 = vmatpush3.bf16.msra.mxu0 %v1355_v17  ;;  %1298 = vmatpush3.bf16.msra.mxu1 %v1355_v17 }
  0x50   : > { %575 = vmatmul.mubr.bf16.vlgmr.msra.gmra.mxu0 %v1356_v18  ;;  %639 = vmatmul.mubr.bf16.vlgmr.msra.gmra.mxu1 %v1359_v19 }
  0x51   : > { %582 = vmatprep.mubr.bf16.mxu0 %v1362_v20  ;;  %646 = vmatprep.mubr.bf16.mxu1 %v1364_v21 }
  0x58   : > { %583 = vmatmul.mubr.bf16.gmra.mxu0 %v1366_v22  ;;  %647 = vmatmul.mubr.bf16.gmra.mxu1 %v1367_v23 }
  0x59   : > { %590 = vmatprep.mubr.bf16.mxu0 %v1368_v24  ;;  %654 = vmatprep.mubr.bf16.mxu1 %v1370_v25 }
  0x60   : > { %591 = vmatmul.mubr.bf16.gmra.mxu0 %v1372_v26  ;;  %655 = vmatmul.mubr.bf16.gmra.mxu1 %v1373_v27 }
  0x61   : > { %598 = vmatprep.mubr.bf16.mxu0 %v1374_v28  ;;  %662 = vmatprep.mubr.bf16.mxu1 %v1376_v29 }
  0x68   : > { %599 = vmatmul.mubr.bf16.gmra.mxu0 %v1378_v30  ;;  %663 = vmatmul.mubr.bf16.gmra.mxu1 %v1379_v31 }
  0x69   : > { %606 = vmatprep.mubr.bf16.mxu0 %v1380_v32  ;;  %670 = vmatprep.mubr.bf16.mxu1 %v1382_v33 }
  0x70   : > { %607 = vmatmul.mubr.bf16.gmra.mxu0 %v1384_v34  ;;  %671 = vmatmul.mubr.bf16.gmra.mxu1 %v1385_v35 }
  0x71   : > { %614 = vmatprep.mubr.bf16.mxu0 %v1386_v36  ;;  %678 = vmatprep.mubr.bf16.mxu1 %v1388_v37 }
  0x78   : > { %615 = vmatmul.mubr.bf16.gmra.mxu0 %v1390_v38  ;;  %679 = vmatmul.mubr.bf16.gmra.mxu1 %v1391_v39 }
  0x79   : > { %622 = vmatprep.mubr.bf16.mxu0 %v1392_v40  ;;  %686 = vmatprep.mubr.bf16.mxu1 %v1394_v41 }
  0x80   : > { %623 = vmatmul.mubr.bf16.gmra.mxu0 %v1396_v42  ;;  %687 = vmatmul.mubr.bf16.gmra.mxu1 %v1397_v43 }
  0x81   : > { %630 = vmatprep.mubr.bf16.mxu0 %v1398_v44  ;;  %694 = vmatprep.mubr.bf16.mxu1 %v1400_v45 }
  0x88   : > { %631 = vmatmul.mubr.bf16.gmra.mxu0 %v1402_v46  ;;  %695 = vmatmul.mubr.bf16.gmra.mxu1 %v1403_v47 }
 0x110   : > { %v1187_v48 = vpop.f32.mrf.mxu0  ;;  %v1235_v49 = vpop.f32.mrf.mxu1 }
 0x112   : > { %v1188_v50 = vpop.f32.mrf.mxu0  ;;  %v1236_v52 = vpop.f32.mrf.mxu1 }
 0x113   : > { %v1189_v53 = vadd.f32 %v1188_v50, %v1187_v48  ;;  %v1237_v54 = vadd.f32 %v1236_v52, %v1235_v49 }
 0x114   : > { %v1190_v56 = vpop.f32.mrf.mxu0  ;;  %v1238_v57 = vpop.f32.mrf.mxu1 }
 0x115   : > { %v710_v58 = vmul.f32 %v1189_v53, %v1665_v51  ;;  %v726_v59 = vmul.f32 %v1237_v54, %v1665_v51 }
 0x116   : > { %v1191_v60 = vpop.f32.mrf.mxu0  ;;  %v1239_v61 = vpop.f32.mrf.mxu1 }
 0x117   : > { %v749_v62 = vadd.f32 %v1670_v55, %v710_v58  ;;  %v765_v63 = vadd.f32 %v1670_v55, %v726_v59  ;;  %v1192_v0 = vadd.f32 %v1191_v60, %v1190_v56  ;;  %v1240_v1 = vadd.f32 %v1239_v61, %v1238_v57 }
 0x118   : > { %v1193_v2 = vpop.f32.mrf.mxu0  ;;  %v1241_v3 = vpop.f32.mrf.mxu1 }
 0x119   : > { %v781_v4 = vmax.f32 %v749_v62, 0.0  ;;  %v797_v5 = vmax.f32 %v765_v63, 0.0  ;;  %v711_v6 = vmul.f32 %v1192_v0, %v1665_v51  ;;  %v727_v7 = vmul.f32 %v1240_v1, %v1665_v51 }
 0x11a   : > { %v1194_v8 = vpop.f32.mrf.mxu0  ;;  %v1242_v9 = vpop.f32.mrf.mxu1 }
 0x11b   : > { %v1139_v10 = vpack.c.bf16 %v781_v4, %v781_v4  ;;  %v1155_v11 = vpack.c.bf16 %v797_v5, %v797_v5  ;;  %v750_v12 = vadd.f32 %v1670_v55, %v711_v6  ;;  %v766_v13 = vadd.f32 %v1670_v55, %v727_v7 }
 0x11c   : > { %v1195_v14 = vadd.f32 %v1194_v8, %v1193_v2  ;;  %v1243_v15 = vadd.f32 %v1242_v9, %v1241_v3  ;;  %v1196_v16 = vpop.f32.mrf.mxu0  ;;  %v1244_v17 = vpop.f32.mrf.mxu1 }
 0x11d   : > { %942 = vst.msk [vmem:[%s1681_s5] sm:$0xf] %vm941_vm0, %v1139_v10  ;;  %958 = vst.msk [vmem:[%s1681_s5 + $0x40] sm:$0xf] %vm941_vm0, %v1155_v11  ;;  %v782_v18 = vmax.f32 %v750_v12, 0.0  ;;  %v798_v19 = vmax.f32 %v766_v13, 0.0 }
 0x11e   : > { %v712_v20 = vmul.f32 %v1195_v14, %v1665_v51  ;;  %v728_v21 = vmul.f32 %v1243_v15, %v1665_v51  ;;  %v1197_v22 = vpop.f32.mrf.mxu0  ;;  %v1245_v23 = vpop.f32.mrf.mxu1 }
 0x11f   : > { %v1140_v24 = vpack.c.bf16 %v782_v18, %v782_v18  ;;  %v1156_v25 = vpack.c.bf16 %v798_v19, %v798_v19  ;;  %v1198_v26 = vadd.f32 %v1197_v22, %v1196_v16  ;;  %v1246_v27 = vadd.f32 %v1245_v23, %v1244_v17 }
 0x120   : > { %v751_v28 = vadd.f32 %v1670_v55, %v712_v20  ;;  %v767_v29 = vadd.f32 %v1670_v55, %v728_v21  ;;  %v1199_v30 = vpop.f32.mrf.mxu0  ;;  %v1247_v31 = vpop.f32.mrf.mxu1 }
 0x121   : > { %943 = vst.msk [vmem:[%s1681_s5 + $0x4] sm:$0xf] %vm941_vm0, %v1140_v24  ;;  %959 = vst.msk [vmem:[%s1681_s5 + $0x44] sm:$0xf] %vm941_vm0, %v1156_v25  ;;  %v713_v32 = vmul.f32 %v1198_v26, %v1665_v51  ;;  %v729_v33 = vmul.f32 %v1246_v27, %v1665_v51 }
 0x122   : > { %v783_v34 = vmax.f32 %v751_v28, 0.0  ;;  %v799_v35 = vmax.f32 %v767_v29, 0.0  ;;  %v1200_v36 = vpop.f32.mrf.mxu0  ;;  %v1248_v37 = vpop.f32.mrf.mxu1 }
 0x123   : > { %v752_v38 = vadd.f32 %v1670_v55, %v713_v32  ;;  %v768_v39 = vadd.f32 %v1670_v55, %v729_v33  ;;  %v1201_v40 = vadd.f32 %v1200_v36, %v1199_v30  ;;  %v1249_v41 = vadd.f32 %v1248_v37, %v1247_v31 }
 0x124   : > { %v1141_v42 = vpack.c.bf16 %v783_v34, %v783_v34  ;;  %v1157_v43 = vpack.c.bf16 %v799_v35, %v799_v35  ;;  %v1202_v44 = vpop.f32.mrf.mxu0  ;;  %v1250_v45 = vpop.f32.mrf.mxu1 }
 0x125   : > { %v784_v46 = vmax.f32 %v752_v38, 0.0  ;;  %v800_v47 = vmax.f32 %v768_v39, 0.0  ;;  %v714_v48 = vmul.f32 %v1201_v40, %v1665_v51  ;;  %v730_v49 = vmul.f32 %v1249_v41, %v1665_v51 }
 0x126   : > { %944 = vst.msk [vmem:[%s1681_s5 + $0x8] sm:$0xf] %vm941_vm0, %v1141_v42  ;;  %960 = vst.msk [vmem:[%s1681_s5 + $0x48] sm:$0xf] %vm941_vm0, %v1157_v43  ;;  %v1203_v50 = vpop.f32.mrf.mxu0  ;;  %v1251_v52 = vpop.f32.mrf.mxu1 }
 0x127   : > { %v1142_v53 = vpack.c.bf16 %v784_v46, %v784_v46  ;;  %v1158_v54 = vpack.c.bf16 %v800_v47, %v800_v47  ;;  %v753_v56 = vadd.f32 %v1670_v55, %v714_v48  ;;  %v769_v57 = vadd.f32 %v1670_v55, %v730_v49 }
 0x128   : > { %v1204_v58 = vadd.f32 %v1203_v50, %v1202_v44  ;;  %v1252_v59 = vadd.f32 %v1251_v52, %v1250_v45  ;;  %v1205_v60 = vpop.f32.mrf.mxu0  ;;  %v1253_v61 = vpop.f32.mrf.mxu1 }
 0x129   : > { %945 = vst.msk [vmem:[%s1681_s5 + $0xc] sm:$0xf] %vm941_vm0, %v1142_v53  ;;  %961 = vst.msk [vmem:[%s1681_s5 + $0x4c] sm:$0xf] %vm941_vm0, %v1158_v54  ;;  %v785_v62 = vmax.f32 %v753_v56, 0.0  ;;  %v801_v63 = vmax.f32 %v769_v57, 0.0 }
 0x12a   : > { %v715_v0 = vmul.f32 %v1204_v58, %v1665_v51  ;;  %v731_v1 = vmul.f32 %v1252_v59, %v1665_v51  ;;  %v1206_v2 = vpop.f32.mrf.mxu0  ;;  %v1254_v3 = vpop.f32.mrf.mxu1 }
 0x12b   : > { %v1143_v4 = vpack.c.bf16 %v785_v62, %v785_v62  ;;  %v1159_v5 = vpack.c.bf16 %v801_v63, %v801_v63  ;;  %v1207_v6 = vadd.f32 %v1206_v2, %v1205_v60  ;;  %v1255_v7 = vadd.f32 %v1254_v3, %v1253_v61 }
 0x12c   : > { %v754_v8 = vadd.f32 %v1670_v55, %v715_v0  ;;  %v770_v9 = vadd.f32 %v1670_v55, %v731_v1  ;;  %v1208_v10 = vpop.f32.mrf.mxu0  ;;  %v1256_v11 = vpop.f32.mrf.mxu1 }
 0x12d   : > { %946 = vst.msk [vmem:[%s1681_s5 + $0x10] sm:$0xf] %vm941_vm0, %v1143_v4  ;;  %962 = vst.msk [vmem:[%s1681_s5 + $0x50] sm:$0xf] %vm941_vm0, %v1159_v5  ;;  %v716_v12 = vmul.f32 %v1207_v6, %v1665_v51  ;;  %v732_v13 = vmul.f32 %v1255_v7, %v1665_v51 }
 0x12e   : > { %v786_v14 = vmax.f32 %v754_v8, 0.0  ;;  %v802_v15 = vmax.f32 %v770_v9, 0.0  ;;  %v1209_v16 = vpop.f32.mrf.mxu0  ;;  %v1257_v17 = vpop.f32.mrf.mxu1 }
 0x12f   : > { %v755_v18 = vadd.f32 %v1670_v55, %v716_v12  ;;  %v771_v19 = vadd.f32 %v1670_v55, %v732_v13  ;;  %v1210_v20 = vadd.f32 %v1209_v16, %v1208_v10  ;;  %v1258_v21 = vadd.f32 %v1257_v17, %v1256_v11 }
 0x130   : > { %v1144_v22 = vpack.c.bf16 %v786_v14, %v786_v14  ;;  %v1160_v23 = vpack.c.bf16 %v802_v15, %v802_v15  ;;  %v1211_v24 = vpop.f32.mrf.mxu0  ;;  %v1259_v25 = vpop.f32.mrf.mxu1 }
 0x131   : > { %v787_v26 = vmax.f32 %v755_v18, 0.0  ;;  %v803_v27 = vmax.f32 %v771_v19, 0.0  ;;  %v717_v28 = vmul.f32 %v1210_v20, %v1665_v51  ;;  %v733_v29 = vmul.f32 %v1258_v21, %v1665_v51 }
 0x132   : > { %947 = vst.msk [vmem:[%s1681_s5 + $0x14] sm:$0xf] %vm941_vm0, %v1144_v22  ;;  %963 = vst.msk [vmem:[%s1681_s5 + $0x54] sm:$0xf] %vm941_vm0, %v1160_v23  ;;  %v1212_v30 = vpop.f32.mrf.mxu0  ;;  %v1260_v31 = vpop.f32.mrf.mxu1 }
 0x133   : > { %v1145_v32 = vpack.c.bf16 %v787_v26, %v787_v26  ;;  %v1161_v33 = vpack.c.bf16 %v803_v27, %v803_v27  ;;  %v756_v34 = vadd.f32 %v1670_v55, %v717_v28  ;;  %v772_v35 = vadd.f32 %v1670_v55, %v733_v29 }
 0x134   : > { %v1213_v36 = vadd.f32 %v1212_v30, %v1211_v24  ;;  %v1261_v37 = vadd.f32 %v1260_v31, %v1259_v25  ;;  %v1214_v38 = vpop.f32.mrf.mxu0  ;;  %v1262_v39 = vpop.f32.mrf.mxu1 }
 0x135   : > { %948 = vst.msk [vmem:[%s1681_s5 + $0x18] sm:$0xf] %vm941_vm0, %v1145_v32  ;;  %964 = vst.msk [vmem:[%s1681_s5 + $0x58] sm:$0xf] %vm941_vm0, %v1161_v33  ;;  %v788_v40 = vmax.f32 %v756_v34, 0.0  ;;  %v804_v41 = vmax.f32 %v772_v35, 0.0 }
 0x136   : > { %v718_v42 = vmul.f32 %v1213_v36, %v1665_v51  ;;  %v734_v43 = vmul.f32 %v1261_v37, %v1665_v51  ;;  %v1215_v44 = vpop.f32.mrf.mxu0  ;;  %v1263_v45 = vpop.f32.mrf.mxu1 }
 0x137   : > { %v1146_v46 = vpack.c.bf16 %v788_v40, %v788_v40  ;;  %v1162_v47 = vpack.c.bf16 %v804_v41, %v804_v41  ;;  %v1216_v48 = vadd.f32 %v1215_v44, %v1214_v38  ;;  %v1264_v49 = vadd.f32 %v1263_v45, %v1262_v39 }
 0x138   : > { %v757_v50 = vadd.f32 %v1670_v55, %v718_v42  ;;  %v773_v52 = vadd.f32 %v1670_v55, %v734_v43  ;;  %v1217_v53 = vpop.f32.mrf.mxu0  ;;  %v1265_v54 = vpop.f32.mrf.mxu1 }
 0x139   : > { %949 = vst.msk [vmem:[%s1681_s5 + $0x1c] sm:$0xf] %vm941_vm0, %v1146_v46  ;;  %965 = vst.msk [vmem:[%s1681_s5 + $0x5c] sm:$0xf] %vm941_vm0, %v1162_v47  ;;  %v719_v56 = vmul.f32 %v1216_v48, %v1665_v51  ;;  %v735_v57 = vmul.f32 %v1264_v49, %v1665_v51 }
 0x13a   : > { %v789_v58 = vmax.f32 %v757_v50, 0.0  ;;  %v805_v59 = vmax.f32 %v773_v52, 0.0  ;;  %v1218_v60 = vpop.f32.mrf.mxu0  ;;  %v1266_v61 = vpop.f32.mrf.mxu1 }
 0x13b   : > { %v758_v62 = vadd.f32 %v1670_v55, %v719_v56  ;;  %v774_v63 = vadd.f32 %v1670_v55, %v735_v57  ;;  %v1219_v0 = vadd.f32 %v1218_v60, %v1217_v53  ;;  %v1267_v1 = vadd.f32 %v1266_v61, %v1265_v54 }
 0x13c   : > { %v1147_v2 = vpack.c.bf16 %v789_v58, %v789_v58  ;;  %v1163_v3 = vpack.c.bf16 %v805_v59, %v805_v59  ;;  %v1220_v4 = vpop.f32.mrf.mxu0  ;;  %v1268_v5 = vpop.f32.mrf.mxu1 }
 0x13d   : > { %v790_v6 = vmax.f32 %v758_v62, 0.0  ;;  %v806_v7 = vmax.f32 %v774_v63, 0.0  ;;  %v720_v8 = vmul.f32 %v1219_v0, %v1665_v51  ;;  %v736_v9 = vmul.f32 %v1267_v1, %v1665_v51 }
 0x13e   : > { %950 = vst.msk [vmem:[%s1681_s5 + $0x20] sm:$0xf] %vm941_vm0, %v1147_v2  ;;  %966 = vst.msk [vmem:[%s1681_s5 + $0x60] sm:$0xf] %vm941_vm0, %v1163_v3  ;;  %v1221_v10 = vpop.f32.mrf.mxu0  ;;  %v1269_v11 = vpop.f32.mrf.mxu1 }
 0x13f   : > { %v1148_v12 = vpack.c.bf16 %v790_v6, %v790_v6  ;;  %v1164_v13 = vpack.c.bf16 %v806_v7, %v806_v7  ;;  %v759_v14 = vadd.f32 %v1670_v55, %v720_v8  ;;  %v775_v15 = vadd.f32 %v1670_v55, %v736_v9 }
 0x140   : > { %v1222_v16 = vadd.f32 %v1221_v10, %v1220_v4  ;;  %v1270_v17 = vadd.f32 %v1269_v11, %v1268_v5  ;;  %v1223_v18 = vpop.f32.mrf.mxu0  ;;  %v1271_v19 = vpop.f32.mrf.mxu1 }
 0x141   : > { %951 = vst.msk [vmem:[%s1681_s5 + $0x24] sm:$0xf] %vm941_vm0, %v1148_v12  ;;  %967 = vst.msk [vmem:[%s1681_s5 + $0x64] sm:$0xf] %vm941_vm0, %v1164_v13  ;;  %v791_v20 = vmax.f32 %v759_v14, 0.0  ;;  %v807_v21 = vmax.f32 %v775_v15, 0.0 }
 0x142   : > { %v721_v22 = vmul.f32 %v1222_v16, %v1665_v51  ;;  %v737_v23 = vmul.f32 %v1270_v17, %v1665_v51  ;;  %v1224_v24 = vpop.f32.mrf.mxu0  ;;  %v1272_v25 = vpop.f32.mrf.mxu1 }
 0x143   : > { %v1149_v26 = vpack.c.bf16 %v791_v20, %v791_v20  ;;  %v1165_v27 = vpack.c.bf16 %v807_v21, %v807_v21  ;;  %v1225_v28 = vadd.f32 %v1224_v24, %v1223_v18  ;;  %v1273_v29 = vadd.f32 %v1272_v25, %v1271_v19 }
 0x144   : > { %v760_v30 = vadd.f32 %v1670_v55, %v721_v22  ;;  %v776_v31 = vadd.f32 %v1670_v55, %v737_v23  ;;  %v1226_v32 = vpop.f32.mrf.mxu0  ;;  %v1274_v33 = vpop.f32.mrf.mxu1 }
 0x145   : > { %952 = vst.msk [vmem:[%s1681_s5 + $0x28] sm:$0xf] %vm941_vm0, %v1149_v26  ;;  %968 = vst.msk [vmem:[%s1681_s5 + $0x68] sm:$0xf] %vm941_vm0, %v1165_v27  ;;  %v722_v34 = vmul.f32 %v1225_v28, %v1665_v51  ;;  %v738_v35 = vmul.f32 %v1273_v29, %v1665_v51 }
 0x146   : > { %v792_v36 = vmax.f32 %v760_v30, 0.0  ;;  %v808_v37 = vmax.f32 %v776_v31, 0.0  ;;  %v1227_v38 = vpop.f32.mrf.mxu0  ;;  %v1275_v39 = vpop.f32.mrf.mxu1 }
 0x147   : > { %v761_v40 = vadd.f32 %v1670_v55, %v722_v34  ;;  %v777_v41 = vadd.f32 %v1670_v55, %v738_v35  ;;  %v1228_v42 = vadd.f32 %v1227_v38, %v1226_v32  ;;  %v1276_v43 = vadd.f32 %v1275_v39, %v1274_v33 }
 0x148   : > { %v1150_v44 = vpack.c.bf16 %v792_v36, %v792_v36  ;;  %v1166_v45 = vpack.c.bf16 %v808_v37, %v808_v37  ;;  %v1229_v46 = vpop.f32.mrf.mxu0  ;;  %v1277_v47 = vpop.f32.mrf.mxu1 }
 0x149   : > { %v793_v48 = vmax.f32 %v761_v40, 0.0  ;;  %v809_v49 = vmax.f32 %v777_v41, 0.0  ;;  %v723_v50 = vmul.f32 %v1228_v42, %v1665_v51  ;;  %v739_v52 = vmul.f32 %v1276_v43, %v1665_v51 }
 0x14a   : > { %953 = vst.msk [vmem:[%s1681_s5 + $0x2c] sm:$0xf] %vm941_vm0, %v1150_v44  ;;  %969 = vst.msk [vmem:[%s1681_s5 + $0x6c] sm:$0xf] %vm941_vm0, %v1166_v45  ;;  %v1230_v53 = vpop.f32.mrf.mxu0  ;;  %v1278_v54 = vpop.f32.mrf.mxu1 }
 0x14b   : > { %v1151_v56 = vpack.c.bf16 %v793_v48, %v793_v48  ;;  %v1167_v57 = vpack.c.bf16 %v809_v49, %v809_v49  ;;  %v762_v58 = vadd.f32 %v1670_v55, %v723_v50  ;;  %v778_v59 = vadd.f32 %v1670_v55, %v739_v52 }
 0x14c   : > { %v1231_v60 = vadd.f32 %v1230_v53, %v1229_v46  ;;  %v1279_v61 = vadd.f32 %v1278_v54, %v1277_v47  ;;  %v1232_v62 = vpop.f32.mrf.mxu0  ;;  %v1280_v63 = vpop.f32.mrf.mxu1 }
 0x14d   : > { %954 = vst.msk [vmem:[%s1681_s5 + $0x30] sm:$0xf] %vm941_vm0, %v1151_v56  ;;  %970 = vst.msk [vmem:[%s1681_s5 + $0x70] sm:$0xf] %vm941_vm0, %v1167_v57  ;;  %v794_v0 = vmax.f32 %v762_v58, 0.0  ;;  %v810_v1 = vmax.f32 %v778_v59, 0.0 }
 0x14e   : > { %v724_v2 = vmul.f32 %v1231_v60, %v1665_v51  ;;  %v740_v3 = vmul.f32 %v1279_v61, %v1665_v51  ;;  %v1233_v4 = vpop.f32.mrf.mxu0  ;;  %v1281_v5 = vpop.f32.mrf.mxu1 }
 0x14f   : > { %v1152_v6 = vpack.c.bf16 %v794_v0, %v794_v0  ;;  %v1168_v7 = vpack.c.bf16 %v810_v1, %v810_v1  ;;  %v1234_v8 = vadd.f32 %v1233_v4, %v1232_v62  ;;  %v1282_v9 = vadd.f32 %v1281_v5, %v1280_v63 }
 0x150   : > { %v763_v10 = vadd.f32 %v1670_v55, %v724_v2  ;;  %v779_v11 = vadd.f32 %v1670_v55, %v740_v3 }
 0x151   : > { %955 = vst.msk [vmem:[%s1681_s5 + $0x34] sm:$0xf] %vm941_vm0, %v1152_v6  ;;  %971 = vst.msk [vmem:[%s1681_s5 + $0x74] sm:$0xf] %vm941_vm0, %v1168_v7  ;;  %v725_v12 = vmul.f32 %v1234_v8, %v1665_v51  ;;  %v741_v13 = vmul.f32 %v1282_v9, %v1665_v51 }
 0x152   : > { %v795_v14 = vmax.f32 %v763_v10, 0.0  ;;  %v811_v15 = vmax.f32 %v779_v11, 0.0 }
 0x153   : > { %v764_v16 = vadd.f32 %v1670_v55, %v725_v12  ;;  %v780_v17 = vadd.f32 %v1670_v55, %v741_v13 }
 0x154   : > { %v1153_v18 = vpack.c.bf16 %v795_v14, %v795_v14  ;;  %v1169_v19 = vpack.c.bf16 %v811_v15, %v811_v15 }
 0x155   : > { %v796_v20 = vmax.f32 %v764_v16, 0.0  ;;  %v812_v21 = vmax.f32 %v780_v17, 0.0 }
 0x156   : > { %956 = vst.msk [vmem:[%s1681_s5 + $0x38] sm:$0xf] %vm941_vm0, %v1153_v18  ;;  %972 = vst.msk [vmem:[%s1681_s5 + $0x78] sm:$0xf] %vm941_vm0, %v1169_v19 }
 0x157   : > { %v1154_v22 = vpack.c.bf16 %v796_v20, %v796_v20  ;;  %v1170_v23 = vpack.c.bf16 %v812_v21, %v812_v21 }
 0x159   : > { %957 = vst.msk [vmem:[%s1681_s5 + $0x3c] sm:$0xf] %vm941_vm0, %v1154_v22  ;;  %973 = vst.msk [vmem:[%s1681_s5 + $0x7c] sm:$0xf] %vm941_vm0, %v1170_v23 }
 0x15a PF: > { %p14_p9 = scmp.ge.s32.totalorder %s1516_s20, 4   ;;  %s1828_s15 = smov %s1458_s16 }
 0x15b   : > { %s1829_s16 = smov %s1462_s17  ;;  %s1830_s17 = smov %s1526_s23 }
 0x15c   : > { %s1831_s18 = smov %s1516_s20  ;;  %16 = sbr.rel (!%p14_p9) target bundleno = 3 (0x3), region = 76 }
 0x161   :  { %996 = vsyncpa [#allocation3], 1 }
 0x162   :  { %998 = vsyncpa [#allocation3 + $0x1], 1 }

</bundles_post_ra>
